<compile_context>
chip_gen: v7x
topology: tpu7x:2x2x1
jax: 0.10.0
libtpu: 0.0.40
codegen_flags: <defaults>
</compile_context>

<pallas_src>
import functools
import math

import jax
import jax.numpy as jnp
from jax.experimental import pallas as pl
from jax.experimental.pallas import tpu as pltpu


def relpos_kernel(x_ref, embt_ref, rep_ref, o_ref, *, heads_per_step):
    """One grid step = (batch b, query chunk q, a tile of heads).

    x_ref   : [hp, n, d]  rows of x for query chunk q, hp heads
    embt_ref: [d, l]      transposed rel-pos embeddings for (b, q)
    rep_ref : [l, N]      constant 0/1 replication matrix (rep[k, k*n+m] = 1)
    o_ref   : [hp, n, N]  output rows; score vs key chunk k replicated over
                          the n key positions inside chunk k
    """
    embt = embt_ref[...]                       # [d, l]  (native dtype)
    rep = rep_ref[...]                         # [l, N]  f32 0/1
    for hh in range(heads_per_step):           # static -> unrolled
        # [n, d] @ [d, l] -> [n, l] on the MXU, f32 accumulation.
        scores = jnp.dot(x_ref[hh], embt, preferred_element_type=jnp.float32)
        # Replicate each key-chunk score across the chunk's key positions with
        # a second MXU matmul (exact, rep is 0/1) -> lane-dense [n, N] store.
        o_ref[hh] = jnp.dot(scores, rep,
                            preferred_element_type=jnp.float32).astype(o_ref.dtype)


def _choose_heads_per_step(h, n, N, d, itemsize, budget_bytes):
    # Per-head VMEM cost: double-buffered output tile + double-buffered x tile.
    per_head = 2 * n * N * itemsize + 2 * n * d * itemsize
    hp = int(max(1, min(h, budget_bytes // max(per_head, 1))))
    while h % hp:          # largest divisor of h within the budget
        hp -= 1
    return hp


def relative_position_forward(x, pos, chunk_size, embeddings_table,
                              max_relative_position,
                              *, vmem_budget_bytes=20 * 1024 * 1024):
    b, h, N, d = x.shape
    l = pos.shape[1]
    n = chunk_size
    assert N == l * n, "x.shape[2] must equal pos.shape[1] * chunk_size"

    # --- plain-JAX glue: clamp + shift indices, gather + transpose emb -----
    idx = jnp.clip(pos, -max_relative_position, max_relative_position)
    idx = idx + max_relative_position
    emb = embeddings_table[idx]                        # [b, l(q), l(k), d]
    emb_t = jnp.swapaxes(emb, -1, -2)                  # [b, l(q), d, l(k)]

    # Constant 0/1 replication matrix: rep[k, k*n + m] = 1.
    key_chunk_of_col = jnp.arange(N, dtype=jnp.int32) // n
    rep = (key_chunk_of_col[None, :]
           == jnp.arange(l, dtype=jnp.int32)[:, None]).astype(jnp.float32)

    itemsize = jnp.dtype(x.dtype).itemsize
    hp = _choose_heads_per_step(h, n, N, d, itemsize, vmem_budget_bytes)
    grid = (b, l, h // hp)      # heads innermost -> emb_t / rep stay resident

    est_vmem = (2 * hp * n * N * itemsize       # output double buffer
                + 2 * hp * n * d * itemsize     # x double buffer
                + 2 * d * l * itemsize          # emb_t double buffer
                + l * N * 4)                    # rep (resident)
    vmem_limit = int(min(48 * 1024 * 1024, max(4 * 1024 * 1024, 2 * est_vmem)))

    kernel = functools.partial(relpos_kernel, heads_per_step=hp)

    return pl.pallas_call(
        kernel,
        out_shape=jax.ShapeDtypeStruct((b, h, N, N), x.dtype),
        grid_spec=pltpu.PrefetchScalarGridSpec(
            num_scalar_prefetch=0,
            grid=grid,
            in_specs=[
                # x rows for (batch bi, head tile hi, query chunk qi).
                pl.BlockSpec((None, hp, n, d),
                             lambda bi, qi, hi: (bi, hi, qi, 0)),
                # Transposed embeddings for (bi, qi): constant over the
                # innermost (head) axis, so the block is not re-DMA'd per head.
                pl.BlockSpec((None, None, d, l),
                             lambda bi, qi, hi: (bi, qi, 0, 0)),
                # Replication matrix: constant over the whole grid.
                pl.BlockSpec((l, N), lambda bi, qi, hi: (0, 0)),
            ],
            out_specs=pl.BlockSpec((None, hp, n, N),
                                   lambda bi, qi, hi: (bi, hi, qi, 0)),
        ),
        compiler_params=pltpu.CompilerParams(
            dimension_semantics=("parallel", "parallel", "parallel"),
            vmem_limit_bytes=vmem_limit),
    )(x, emb_t, rep)


def reference_forward(x, pos, chunk_size, embeddings_table, max_relative_position):
    b, h, N, d = x.shape
    l = pos.shape[1]
    n = chunk_size
    idx = jnp.clip(pos, -max_relative_position, max_relative_position) + max_relative_position
    emb = embeddings_table[idx]                               # [b, l, l, d]
    x_c = x.reshape(b, h, l, n, d)                            # q-chunk, in-chunk idx
    scores = jnp.einsum("bhqid,bqkd->bhqik", x_c, emb)        # [b, h, l, n, l]
    scores = scores.reshape(b, h, N, l)
    out = jnp.repeat(scores, n, axis=-1)                      # [b, h, N, N]
    return out


if __name__ == "__main__":
    # Small deterministic config.
    b, h = 2, 2
    l = 4                  # number of chunks
    n = 8                  # chunk_size
    d = 32                 # hidden dim
    N = l * n
    max_relative_position = 3
    table_rows = 2 * max_relative_position + 1

    key = jax.random.PRNGKey(0)
    k_x, k_tab = jax.random.split(key)

    # Parameter: xavier_uniform_ on [2P+1, dim]
    fan_in, fan_out = d, table_rows
    bound = math.sqrt(6.0 / (fan_in + fan_out))
    embeddings_table = jax.random.uniform(
        k_tab, (table_rows, d), dtype=jnp.float32, minval=-bound, maxval=bound)

    x = jax.random.normal(k_x, (b, h, N, d), dtype=jnp.float32)

    # Relative positions: pos[b, i, j] = i - j (broadcast over batch).
    ar = jnp.arange(l, dtype=jnp.int32)
    pos = jnp.broadcast_to(ar[:, None] - ar[None, :], (b, l, l)).astype(jnp.int32)

    out = relative_position_forward(x, pos, n, embeddings_table,
                                    max_relative_position)
    out = jax.block_until_ready(out)

    ref = reference_forward(x, pos, n, embeddings_table, max_relative_position)
    assert out.shape == (b, h, N, N), out.shape
    assert jnp.allclose(out, ref, atol=1e-5, rtol=1e-5), "mismatch vs reference"

    print("KERNEL_OK")
</pallas_src>

<mosaic_0001>
module attributes {stable_mosaic.version = 11 : i64} {
  func.func @relpos_kernel(%arg0: i32, %arg1: i32, %arg2: i32, %arg3: memref<1x2x8x32xf32, #tpu.memory_space<vmem>>, %arg4: memref<1x1x32x4xf32, #tpu.memory_space<vmem>>, %arg5: memref<4x32xf32, #tpu.memory_space<vmem>>, %arg6: memref<1x2x8x32xf32, #tpu.memory_space<vmem>>) attributes {dimension_semantics = [#tpu.dimension_semantics<parallel>, #tpu.dimension_semantics<parallel>, #tpu.dimension_semantics<parallel>], iteration_bounds = array<i64: 2, 4, 1>, scalar_prefetch = 0 : i64, scratch_operands = 0 : i64, tpu.core_type = #tpu.core_type<tc>, window_params = [{transform_indices = @transform_0, window_bounds = array<i64: 1, 2, 8, 32>}, {transform_indices = @transform_1, window_bounds = array<i64: 1, 1, 32, 4>}, {pipeline_mode = #tpu.pipeline_mode<synchronous>, transform_indices = @transform_2, window_bounds = array<i64: 4, 32>}, {transform_indices = @transform_3, window_bounds = array<i64: 1, 2, 8, 32>}]} {
    %c0 = arith.constant 0 : index
    %c0_0 = arith.constant 0 : index
    %c0_1 = arith.constant 0 : index
    %c0_2 = arith.constant 0 : index
    %0 = vector.load %arg4[%c0, %c0_0, %c0_1, %c0_2] : memref<1x1x32x4xf32, #tpu.memory_space<vmem>>, vector<1x1x32x4xf32>
    %1 = vector.shape_cast %0 : vector<1x1x32x4xf32> to vector<32x4xf32>
    %c0_3 = arith.constant 0 : index
    %c0_4 = arith.constant 0 : index
    %2 = vector.load %arg5[%c0_3, %c0_4] : memref<4x32xf32, #tpu.memory_space<vmem>>, vector<4x32xf32>
    %c0_5 = arith.constant 0 : index
    %c0_6 = arith.constant 0 : index
    %c0_7 = arith.constant 0 : index
    %c0_8 = arith.constant 0 : index
    %3 = vector.load %arg3[%c0_5, %c0_6, %c0_7, %c0_8] : memref<1x2x8x32xf32, #tpu.memory_space<vmem>>, vector<1x1x8x32xf32>
    %4 = vector.shape_cast %3 : vector<1x1x8x32xf32> to vector<8x32xf32>
    %cst = arith.constant dense<0.000000e+00> : vector<8x4xf32>
    %5 = tpu.matmul %4, %1, %cst {dimension_numbers = #tpu.dot_dimension_numbers<[1], [0], [0], [1], [0, 0, 1, 1], [], []>} : vector<8x32xf32>, vector<32x4xf32>, vector<8x4xf32> -> vector<8x4xf32>
    %cst_9 = arith.constant dense<0.000000e+00> : vector<8x32xf32>
    %6 = tpu.matmul %5, %2, %cst_9 {dimension_numbers = #tpu.dot_dimension_numbers<[1], [0], [0], [1], [0, 0, 1, 1], [], []>} : vector<8x4xf32>, vector<4x32xf32>, vector<8x32xf32> -> vector<8x32xf32>
    %c0_10 = arith.constant 0 : index
    %c0_11 = arith.constant 0 : index
    %c0_12 = arith.constant 0 : index
    %c0_13 = arith.constant 0 : index
    %7 = vector.load %arg6[%c0_10, %c0_11, %c0_12, %c0_13] : memref<1x2x8x32xf32, #tpu.memory_space<vmem>>, vector<1x1x8x32xf32>
    %8 = vector.shape_cast %7 : vector<1x1x8x32xf32> to vector<8x32xf32>
    %9 = vector.shape_cast %6 : vector<8x32xf32> to vector<1x1x8x32xf32>
    tpu.vector_store %arg6[%c0_10, %c0_11, %c0_12, %c0_13], %9 {strides = array<i32>} : memref<1x2x8x32xf32, #tpu.memory_space<vmem>>, vector<1x1x8x32xf32>,
    %c0_14 = arith.constant 0 : index
    %c1 = arith.constant 1 : index
    %c0_15 = arith.constant 0 : index
    %c0_16 = arith.constant 0 : index
    %10 = vector.load %arg3[%c0_14, %c1, %c0_15, %c0_16] : memref<1x2x8x32xf32, #tpu.memory_space<vmem>>, vector<1x1x8x32xf32>
    %11 = vector.shape_cast %10 : vector<1x1x8x32xf32> to vector<8x32xf32>
    %cst_17 = arith.constant dense<0.000000e+00> : vector<8x4xf32>
    %12 = tpu.matmul %11, %1, %cst_17 {dimension_numbers = #tpu.dot_dimension_numbers<[1], [0], [0], [1], [0, 0, 1, 1], [], []>} : vector<8x32xf32>, vector<32x4xf32>, vector<8x4xf32> -> vector<8x4xf32>
    %cst_18 = arith.constant dense<0.000000e+00> : vector<8x32xf32>
    %13 = tpu.matmul %12, %2, %cst_18 {dimension_numbers = #tpu.dot_dimension_numbers<[1], [0], [0], [1], [0, 0, 1, 1], [], []>} : vector<8x4xf32>, vector<4x32xf32>, vector<8x32xf32> -> vector<8x32xf32>
    %c0_19 = arith.constant 0 : index
    %c1_20 = arith.constant 1 : index
    %c0_21 = arith.constant 0 : index
    %c0_22 = arith.constant 0 : index
    %14 = vector.load %arg6[%c0_19, %c1_20, %c0_21, %c0_22] : memref<1x2x8x32xf32, #tpu.memory_space<vmem>>, vector<1x1x8x32xf32>
    %15 = vector.shape_cast %14 : vector<1x1x8x32xf32> to vector<8x32xf32>
    %16 = vector.shape_cast %13 : vector<8x32xf32> to vector<1x1x8x32xf32>
    tpu.vector_store %arg6[%c0_19, %c1_20, %c0_21, %c0_22], %16 {strides = array<i32>} : memref<1x2x8x32xf32, #tpu.memory_space<vmem>>, vector<1x1x8x32xf32>,
    return
  }
  func.func @transform_0(%arg0: i32, %arg1: i32, %arg2: i32) -> (i32, i32, i32, i32) {
    %c0_i32 = arith.constant 0 : i32
    %c0_i32_0 = arith.constant 0 : i32
    return %arg0, %arg2, %arg1, %c0_i32 : i32, i32, i32, i32
  }
  func.func @transform_1(%arg0: i32, %arg1: i32, %arg2: i32) -> (i32, i32, i32, i32) {
    %c0_i32 = arith.constant 0 : i32
    %c0_i32_0 = arith.constant 0 : i32
    %c0_i32_1 = arith.constant 0 : i32
    return %arg0, %arg1, %c0_i32, %c0_i32_0 : i32, i32, i32, i32
  }
  func.func @transform_2(%arg0: i32, %arg1: i32, %arg2: i32) -> (i32, i32) {
    %c0_i32 = arith.constant 0 : i32
    %c0_i32_0 = arith.constant 0 : i32
    %c0_i32_1 = arith.constant 0 : i32
    return %c0_i32, %c0_i32_0 : i32, i32
  }
  func.func @transform_3(%arg0: i32, %arg1: i32, %arg2: i32) -> (i32, i32, i32, i32) {
    %c0_i32 = arith.constant 0 : i32
    %c0_i32_0 = arith.constant 0 : i32
    return %arg0, %arg2, %arg1, %c0_i32 : i32, i32, i32, i32
  }
}

</mosaic_0001>

<bundles_post_ra>
// kernel: tpu_custom_call.1
= control target key start
LH: loop header
LB: loop body
LE: loop exit
PB: predicated region body
PF: predicated region fallthrough
CT: control target
= control target key end

     0   :  { %8 = vsyncpa [#allocation4], 0  ;;  %s1170_s0 = inlined_call_operand.vmem [shape: f32[2,2,32,32], index: 0, kind: input, shape index: {}]   ;;  %s1171_s1 = inlined_call_operand.vmem [shape: f32[2,4,32,4], index: 1, kind: input, shape index: {}]   ;;  %s1172_s2 = inlined_call_operand.vmem [shape: f32[4,32], index: 2, kind: input, shape index: {}]   ;;  %s1173_s3 = inlined_call_operand.hbm [shape: f32[2,2,32,32], index: 3, kind: output, shape index: {}]  }
   0x1   :  { %10 = vsyncpa [#allocation4 + $0x1], 0  ;;  %s997_s12 = smov 0   ;;  %s999_s13 = smov 0  }
   0x2   :  { %s1001_s14 = smov 0   ;;  %s1003_s15 = smov 0  }
   0x3   :  { %s1005_s16 = smov 0   ;;  %s1007_s17 = smov 0  }
   0x4   :  { %s1009_s18 = smov 0   ;;  %s1011_s19 = smov 0  }
   0x5 LB: > { %s713_s20 = sadd.s32 4294967295, %s968_s19   ;;  %s714_s21 = sadd.s32 4294967294, %s968_s19   ;;  %s968_s19 = sphi %s1011_s19, %s16_s19   ;;  %s964_s18 = sphi %s1009_s18, %s1183_s18   ;;  %s960_s17 = sphi %s1007_s17, %s1182_s17   ;;  %s956_s16 = sphi %s1005_s16, %s1181_s16   ;;  %s952_s15 = sphi %s1003_s15, %s1180_s15   ;;  %s948_s14 = sphi %s1001_s14, %s1179_s14   ;;  %s944_s13 = sphi %s999_s13, %s1178_s13   ;;  %s940_s12 = sphi %s997_s12, %s1177_s12  }
   0x6   : > { %s31_s22 = sadd.s32 1, %s960_s17  ;;  %s35_s23 = sadd.s32 1, %s964_s18 }
   0x7   : > { %p33_p0 = scmp.ge.s32.totalorder %s31_s22, 4  ;;  %p53_p1 = scmp.ne.s32.totalorder %s948_s14, %s944_s13 }
   0x8   : > { %p54_p2 = scmp.eq.s32.totalorder %s968_s19, 0  ;;  %p136_p5 = scmp.eq.s32.totalorder %s713_s20, 7 }
   0x9   : > { %s1185_s22 = smov (%p33_p0, %s31_s22), 0  ;;  %s1187_s23 = smov (!%p33_p0, %s35_s23), %s964_s18 }
   0xa   : > { %s42_s24 = ssub.s32 %s960_s17, %s1185_s22  ;;  %p1049_p3 = por %p54_p2, %p53_p1 }
   0xb   : > { %p37_p4 = scmp.ge.s32.totalorder %s1187_s23, 2  ;;  %p141_p6 = scmp.ne.s32.totalorder %s944_s13, %s940_s12 }
   0xc   : > { %p142_p7 = scmp.eq.s32.totalorder %s714_s21, 7  ;;  %p1057_p8 = por %p136_p5, %p53_p1 }
   0xd   : > { %s1189_s23 = smov (%p37_p4, %s1187_s23), 0  ;;  %s46_s30 = sadd.s32 1, %s948_s14 }
   0xe   : > { %p1061_p9 = por %p142_p7, %p141_p6  ;;  %s39_s28 = ssub.s32 %s964_s18, %s1189_s23 }
   0xf   : > { %s43_s29 = sor.u32 %s42_s24, %s39_s28  ;;  %p716_p11 = scmp.ge.s32.totalorder %s968_s19, 8 }
  0x10   : > { %p44_p10 = scmp.eq.s32.totalorder %s43_s29, 0 }
  0x11   : > { %161 = sbr.rel (%p716_p11) target bundleno = 32 (0x20), region = 20 }
  0x12   : > { %s1069_s4 = scalar_select %p44_p10, %s948_s14, %s46_s30  }
  0x18   : > { %164 = sbr.rel (!%p1049_p3) target bundleno = 32 (0x20), region = 24  ;;  %s166_s5 = sand.u32 (%p1049_p3), 1, %s948_s14  }
  0x19   : > { %s718_s6 = sshll.u32 (%p1049_p3), %s964_s18, 3  ;;  %s717_s7 = sshll.u32 (%p1049_p3), %s166_s5, 4 }
  0x1a   : > { %s173_s8 = sadd.s32 (%p1049_p3), %s960_s17, %s718_s6  ;;  %s168_s21 = scalar_lea.vmem (%p1049_p3), [#allocation2], %s717_s7 }
  0x1b   : > { %s719_s9 = sshll.u32 (%p1049_p3), %s173_s8, 3 }
  0x1c   : > { %s175_s20 = scalar_lea.vmem (%p1049_p3), %s1170_s0, %s719_s9 }
  0x1d   : > { %v205_v0 = vld [vmem:[%s175_s20] sm:$0xff] (%p1049_p3) }
  0x1e   : > { %v207_v1 = vld [vmem:[%s175_s20 + $0x20] sm:$0xff] (%p1049_p3)  ;;  %206 = vst [vmem:[%s168_s21] sm:$0xff] (%p1049_p3), %v205_v0 }
  0x1f   : > { %208 = vst [vmem:[%s168_s21 + $0x8] sm:$0xff] %v207_v1 }
  0x20 PF: > { %p720_p12 = scmp.ge.s32.totalorder %s968_s19, 1  ;;  %p225_p13 = scmp.lt.s32.totalorder %s968_s19, 9 }
  0x22   : > { %p226_p0 = pnand %p720_p12, %p225_p13 }
  0x23   : > { %p265_p1 = scmp.lt.s32.totalorder (!%p226_p0), %s956_s16, 1  ;;  %p267_p2 = scmp.lt.s32.totalorder (!%p226_p0), %s952_s15, 3  ;;  %v970_v2 = vmov (!%p226_p0), 0.0|0.0   ;;  %vm971_vm0 = vmmov (!%p226_p0), 0   ;;  %v972_v3 = vmov (!%p226_p0), 0.0   ;;  %vm359_vm1 = vcmask (!%p226_p0), 1043456  }
  0x24   : > { %229 = sbr.rel (%p226_p0) target bundleno = 720 (0x2d0), region = 66  ;;  %785 = vmatprep.subr.bf16.mxu0 (!%p226_p0), %v970_v2  ;;  %761 = vmatprep.mubr.msk.f32.mxu0 (!%p226_p0), %vm971_vm0, %v972_v3  ;;  %v279_v4 = vld [vmem:[%s1172_s2] sm:$0xf] (!%p226_p0)  ;;  %s232_s8 = sand.u32 (!%p226_p0), 1, %s944_s13   ;;  %vm281_vm2 = vcmask (!%p226_p0), 261120   ;;  %vm355_vm3 = vcmask (!%p226_p0), 31744  }
  0x25   : > { %764 = vmatprep.subr.mxu1 (!%p226_p0), %v972_v3  ;;  %766 = vmatprep.mubr.msk.f32.mxu1 (!%p226_p0), %vm971_vm0, %v972_v3  ;;  %s721_s20 = sshll.u32 (!%p226_p0), %s232_s8, 4  ;;  %s735_s25 = sshll.u32 (!%p226_p0), %s956_s16, 3 }
  0x26   : > { %765 = vmatpush3.msk.msra.mxu1 (!%p226_p0), %vm359_vm1, %v279_v4  ;;  %s234_s21 = scalar_lea.vmem (!%p226_p0), [#allocation2], %s721_s20  ;;  %s263_s24 = scalar_lea.vmem (!%p226_p0), [#allocation3], %s721_s20 }
  0x27   : > { %791 = vmatprep.subr.bf16.mxu1 (!%p226_p0), %v970_v2  ;;  %v280_v11 = vld [vmem:[%s234_s21] sm:$0xff] (!%p226_p0)  ;;  %v729_v14 = vld [vmem:[%s234_s21 + $0x8] sm:$0xff] (!%p226_p0)  ;;  %s1118_s9 = scalar_lea.sflag (!%p226_p0), [#allocation4], %s232_s8 }
  0x2b   : > { %s266_s28 = scalar_select %p265_p1, %s956_s16, 1 }
  0x2c   : > { %s268_s29 = scalar_select %p267_p2, %s952_s15, 3 }
  0x2d   : > { %s724_s30 = sshll.u32 %s266_s28, 4  ;;  %s599_s28 = sadd.s32 %s952_s15, %s735_s25 }
  0x2e   : > { %s723_s5 = sshll.u32 %s268_s29, 2  ;;  %s602_s29 = sshll.u32 %s263_s24, 4  ;;  %s1108_s29 = int_to_ptr.vmem [resolvable:$true] %s602_s29 }
  0x2f   : > { %s271_s6 = sadd.s32 %s724_s30, %s723_s5  ;;  %s736_s30 = sshll.u32 %s599_s28, 7 }
  0x30   : > { %s725_s7 = sshll.u32 %s271_s6, 3  ;;  %s874_s15 = scalar_lea.vmem %s1108_s29, 256 }
  0x31   : > { %s273_s11 = scalar_lea.vmem %s1171_s1, %s725_s7  ;;  %s1113_s7 = scalar_lea.hbm %s1173_s3, %s736_s30 }
  0x32   : > { %v275_v5 = vld [vmem:[%s273_s11] sm:$0xff]  ;;  %v276_v6 = vld [vmem:[%s273_s11 + $0x8] sm:$0xff]  ;;  %v277_v7 = vld [vmem:[%s273_s11 + $0x10] sm:$0xff]  ;;  %p875_p3 = scmp.ne.s32.totalorder %s1108_s29, %s874_s15  ;;  %s973_s16 = smov [#allocation3]  }
  0x33   : > { %v786_v8 = vpack.c.bf16 %v276_v6, %v275_v5  ;;  %v278_v9 = vld [vmem:[%s273_s11 + $0x18] sm:$0xff]  ;;  %s878_s10 = sshll.u32 %s973_s16, 4  ;;  %s879_s10 = int_to_ptr.vmem [resolvable:$false] %s878_s10 }
  0x34   : > { %v789_v10 = vpack.c.bf16 %v278_v9, %v277_v7  ;;  %p876_p4 = pnand %p875_p3, %p1057_p8  ;;  %s880_s11 = scalar_lea.vmem %s879_s10, 512 }
  0x35   : > { %787 = vmatpush3.bf16.msra.mxu0 %v786_v8  ;;  %p881_p6 = scmp.lt.s32.totalorder %s1108_s29, %s879_s10  ;;  %p882_p7 = scmp.lt.s32.totalorder %s880_s11, %s874_s15 }
  0x36   : > { %788 = vmatprep.subr.bf16.mxu0 %v970_v2  ;;  %p877_p5 = pneg %p876_p4 }
  0x37   : > { %p883_p10 = por %p882_p7, %p881_p6 }
  0x39   : > { %790 = vmatpush3.bf16.msra.mxu0 %v789_v10  ;;  %p884_p11 = pnand %p883_p10, %p877_p5 }
  0x3a   : > { %780 = vmatprep.subr.mxu0 %v972_v3 }
  0x3c   : > { %762 = vmatmul.mubr.msk.f32.vlgmr.msra.gmra.mrb[0].mxu0 %vm281_vm2, %v280_v11 }
  0x3d   : > { %781 = vmatpush3.msk.msra.mxu0 %vm359_vm1, %v279_v4  ;;  %782 = vmatprep.mubr.msk.f32.mxu0 %vm971_vm0, %v972_v3 }
 0x10f   : > { %v351_v12 = vpop.f32.mrb[0].mxu0 }
 0x110   : > { %v763_v13 = vpop.f32.mrb[1].mxu0  ;;  %767 = vmatmul.mubr.msk.f32.vlgmr.msra.gmra.mrb[0].mxu1 %vm355_vm3, %v351_v12 }
 0x111   : > { %793 = vmatpush3.bf16.msra.mxu1 %v786_v8  ;;  %777 = vmatprep.mubr.msk.f32.mxu1 %vm971_vm0, %v972_v3 }
 0x112   : > { %794 = vmatprep.subr.bf16.mxu1 %v970_v2 }
 0x115   : > { %796 = vmatpush3.bf16.msra.mxu1 %v789_v10 }
 0x118   : > { %778 = vmatmul.mubr.msk.f32.vlgmr.msra.gmra.mrb[2].mxu1 %vm281_vm2, %v729_v14 }
 0x1e3   : > { %v429_v15 = vpop.f32.mrb[0].mxu1 }
 0x1e4   : > { %433 = vst.msk [vmem:[%s263_s24] sm:$0xff] %vm281_vm2, %v429_v15  ;;  %v768_v16 = vpop.f32.mrb[1].mxu1 }
 0x1eb   : > { %v505_v17 = vpop.f32.mrb[2].mxu1 }
 0x1ec   : > { %v779_v18 = vpop.f32.mrb[3].mxu1  ;;  %783 = vmatmul.mubr.msk.f32.vlgmr.msra.gmra.mrb[2].mxu0 %vm355_vm3, %v505_v17 }
 0x2bf   : > { %v578_v19 = vpop.f32.mrb[2].mxu0 }
 0x2c0   : > { %733 = vst.msk [vmem:[%s263_s24 + $0x8] sm:$0xff] %vm281_vm2, %v578_v19  ;;  %v784_v20 = vpop.f32.mrb[3].mxu0 }
 0x2c1   : > { %887 = shalt.err (!%p884_p11)
}
 0x2c2   : > { %s888_s8 = scalar_lea.hbm %s1113_s7, 256  ;;  %s892_s24 = scalar_lea.hbm %s1173_s3, 2048 }
 0x2c3   : > { %p889_p12 = scmp.ne.s32.totalorder %s1113_s7, %s888_s8  ;;  %p893_p1 = scmp.lt.u32.totalorder %s1113_s7, %s1173_s3 }
 0x2c4   : > { %p894_p2 = scmp.lt.u32.totalorder %s892_s24, %s888_s8  ;;  %p896_p4 = scmp.lt.u32.totalorder %s888_s8, %s1113_s7 }
 0x2c5   : > { %p890_p13 = pnand %p889_p12, %p1057_p8 }
 0x2c6   : > { %p895_p3 = por %p894_p2, %p893_p1 }
 0x2c7   : > { %p891_p0 = pneg %p890_p13 }
 0x2c8   : > { %p897_p5 = por %p896_p4, %p895_p3 }
 0x2ca   : > { %p898_p6 = pnand %p897_p5, %p891_p0 }
 0x2cc   : > { %901 = shalt.err (!%p898_p6)
}
 0x2cd   : > { %s974_s30 = smov 128   ;;  %s975_s5 = smov 512  }
 0x2ce   : > { %s976_s6 = smov 8  }
 0x2cf   : > { %797 = dma.vmem_to_hbm [thread:$0]  (%p1057_p8), %s1108_s29, 256, %s1113_s7, %s1118_s9, %s974_s30, %s975_s5, %s976_s6  }
 0x2d0 PF: > { %p803_p7 = scmp.ge.s32.totalorder %s968_s19, 2  ;;  %s617_s15 = sand.u32 1, %s940_s12  }
 0x2d1   : > { %s618_s16 = scalar_lea.sflag [#allocation4], %s617_s15 }
 0x2d2   : > { %p800_p10 = pnand %p803_p7, %p1061_p9 }
 0x2d4   : > { %935 = dma.done.wait (!%p800_p10), %s618_s16, 256  }
 0x2d5   : > { %937 = vsyncadd (!%p800_p10), %s618_s16, 4294967040  ;;  %s16_s19 = sadd.s32 1, %s968_s19   ;;  %s1177_s12 = smov %s944_s13 }
 0x2d6   : > { %p13_p11 = scmp.ge.s32.totalorder %s16_s19, 10   ;;  %s1178_s13 = smov %s948_s14 }
 0x2d7   : > { %s1179_s14 = smov %s1069_s4  ;;  %s1180_s15 = smov %s960_s17 }
 0x2d8   : > { %s1181_s16 = smov %s964_s18  ;;  %s1182_s17 = smov %s1185_s22 }
 0x2d9   : > { %s1183_s18 = smov %s1189_s23  ;;  %15 = sbr.rel (!%p13_p11) target bundleno = 5 (0x5), region = 115 }
 0x2e0   :  { %623 = vsyncpa [#allocation4], 1 }
 0x2e1   :  { %625 = vsyncpa [#allocation4 + $0x1], 1 }

</bundles_post_ra>
